<compile_context>
chip_gen: v7x
topology: tpu7x:2x2x1
jax: 0.10.0
libtpu: 0.0.40
codegen_flags: <defaults>
</compile_context>

<pallas_src>
import functools
import math

import jax
import jax.numpy as jnp
from jax.experimental import pallas as pl
from jax.experimental.pallas import tpu as pltpu


def _round_up(x: int, m: int) -> int:
    return ((x + m - 1) // m) * m


# ----------------------------------------------------------------------------
# Kernel 1: EMA parameter update (single fused, tiled, in-place sweep)
# ----------------------------------------------------------------------------
_EMA_LANES = 512          # lane-dense last dim (multiple of 128) -> unmasked vst
_EMA_ROWS_PER_TILE = 512  # 512 * 512 * 4B = 1 MiB per buffer; ~6 MiB live with
                          # double-buffering of 2 inputs + output. Safe on
                          # v5e / v6e / v7x default VMEM limits.


def _ema_kernel(avg_ref, param_ref, decay_ref, out_ref):
    d = decay_ref[0]                       # scalar from SMEM (no recompile)
    avg = avg_ref[...]
    out_ref[...] = avg + (param_ref[...] - avg) * (1.0 - d)


@functools.partial(jax.jit, donate_argnums=(0,))
def _ema_update_slab(avg_slab, param_slab, decay):
    """avg_slab <- avg_slab + (param_slab - avg_slab) * (1 - decay), in place."""
    rows, lanes = avg_slab.shape
    tr = min(_EMA_ROWS_PER_TILE, rows)     # rows is padded to a multiple of tr
    grid = (rows // tr,)
    return pl.pallas_call(
        _ema_kernel,
        out_shape=jax.ShapeDtypeStruct((rows, lanes), avg_slab.dtype),
        grid=grid,
        in_specs=[
            pl.BlockSpec((tr, lanes), lambda i: (i, 0)),
            pl.BlockSpec((tr, lanes), lambda i: (i, 0)),
            pl.BlockSpec(memory_space=pltpu.MemorySpace.SMEM),
        ],
        out_specs=pl.BlockSpec((tr, lanes), lambda i: (i, 0)),
        input_output_aliases={0: 0},       # in-place EMA: no 2nd HBM copy
        compiler_params=pltpu.CompilerParams(
            dimension_semantics=("parallel",)),
    )(avg_slab, param_slab, decay)


def _pack_params(params, names):
    """Flatten + concat all params (any rank) into one lane-dense f32 slab."""
    # Averaged copy kept in f32 so bf16 params don't lose EMA precision.
    flat = jnp.concatenate(
        [jnp.ravel(params[n]).astype(jnp.float32) for n in names])
    total = flat.shape[0]
    rows = max(-(-total // _EMA_LANES), 8)
    rows = _round_up(rows, 8)                       # sublane-full
    tr = min(_EMA_ROWS_PER_TILE, rows)
    rows = _round_up(rows, tr)                      # exact tile grid
    padded = jnp.zeros((rows * _EMA_LANES,), jnp.float32).at[:total].set(flat)
    return padded.reshape(rows, _EMA_LANES)


def _unpack_params(slab, names, shapes):
    flat = slab.reshape(-1)
    out, off = {}, 0
    for n, shp in zip(names, shapes):
        sz = math.prod(shp) if len(shp) > 0 else 1
        out[n] = flat[off:off + sz].reshape(shp)
        off += sz
    return out


# ----------------------------------------------------------------------------
# Kernel 2: forward pass through the averaged model (Linear stand-in)
# ----------------------------------------------------------------------------
def _linear_kernel(x_ref, w_ref, b_ref, o_ref, acc_ref):
    k = pl.program_id(2)

    @pl.when(k == 0)
    def _():
        acc_ref[...] = jnp.zeros_like(acc_ref)

    acc_ref[...] += jnp.dot(x_ref[...], w_ref[...],
                            preferred_element_type=jnp.float32)

    @pl.when(k == pl.num_programs(2) - 1)
    def _():
        # Bias only in the epilogue; inner loop stays pure MXU accumulate.
        o_ref[...] = (acc_ref[...] + b_ref[...]).astype(o_ref.dtype)


@jax.jit
def averaged_model_forward(x, w, b):
    """forward(batch) of the averaged model: y = x @ W + b via tiled Pallas."""
    B, S, K = x.shape
    N = w.shape[1]
    M = B * S
    x2 = x.reshape(M, K)

    # Lane-dense padding + per-axis tiles (VMEM budget safe on v5e/v6e/v7x).
    Kp = _round_up(K, 128)
    Np = _round_up(N, 128)
    tm = 256 if M >= 256 else _round_up(M, 8)
    tn = 256 if Np >= 256 else Np
    tk = 512 if Kp >= 512 else Kp
    Mp = _round_up(M, tm)
    Kp = _round_up(Kp, tk)
    Np = _round_up(Np, tn)

    xp = jnp.zeros((Mp, Kp), x.dtype).at[:M, :K].set(x2)
    wp = jnp.zeros((Kp, Np), w.dtype).at[:K, :N].set(w)
    bp = jnp.zeros((1, Np), jnp.float32).at[0, :N].set(b.astype(jnp.float32))

    grid = (Mp // tm, Np // tn, Kp // tk)
    out = pl.pallas_call(
        _linear_kernel,
        out_shape=jax.ShapeDtypeStruct((Mp, Np), x.dtype),
        grid_spec=pltpu.PrefetchScalarGridSpec(
            num_scalar_prefetch=0,
            grid=grid,
            in_specs=[
                pl.BlockSpec((tm, tk), lambda i, j, k: (i, k)),
                pl.BlockSpec((tk, tn), lambda i, j, k: (k, j)),
                pl.BlockSpec((1, tn), lambda i, j, k: (0, j)),
            ],
            out_specs=pl.BlockSpec((tm, tn), lambda i, j, k: (i, j)),
            scratch_shapes=[pltpu.VMEM((tm, tn), jnp.float32)],
        ),
        compiler_params=pltpu.CompilerParams(
            dimension_semantics=("parallel", "parallel", "arbitrary")),
    )(xp, wp, bp)
    return out[:M, :N].reshape(B, S, N)


# ----------------------------------------------------------------------------
# AlphaFoldSWA wrapper (glue in plain JAX / Python)
# ----------------------------------------------------------------------------
class AlphaFoldSWA:
    def __init__(self, model_params, enabled, decay_rate):
        self.enabled = enabled
        self.decay_rate = decay_rate
        if enabled:
            # AveragedModel starts as a copy of the wrapped model's params,
            # stored as one fused lane-dense f32 slab.
            self._names = list(model_params.keys())
            self._shapes = [tuple(model_params[n].shape) for n in self._names]
            self.averaged_slab = _pack_params(model_params, self._names)
            self.num_averaged = 0
        else:
            self.averaged_slab = None

    @property
    def averaged_params(self):
        if self.averaged_slab is None:
            return None
        return _unpack_params(self.averaged_slab, self._names, self._shapes)

    def update(self, model_params):
        if self.averaged_slab is None:
            return
        param_slab = _pack_params(model_params, self._names)
        if self.num_averaged == 0:
            # First update_parameters call in AveragedModel copies params.
            self.averaged_slab = param_slab
        else:
            decay = jnp.full((1,), self.decay_rate, jnp.float32)
            self.averaged_slab = _ema_update_slab(
                self.averaged_slab, param_slab, decay)
        self.num_averaged += 1

    def forward(self, batch):
        if self.averaged_slab is None:
            raise RuntimeError("Weight averaging is not enabled")
        p = self.averaged_params
        return averaged_model_forward(batch, p["w"], p["b"])


# ----------------------------------------------------------------------------
# Pure-JAX reference for correctness check
# ----------------------------------------------------------------------------
def _ref_ema(avg, p, d):
    return avg + (p - avg) * (1.0 - d)


def _ref_forward(x, w, b):
    return jnp.einsum("bsk,kn->bsn", x, w) + b


if __name__ == "__main__":
    key = jax.random.PRNGKey(0)
    k1, k2, k3, k4, k5 = jax.random.split(key, 5)

    B, S, H = 2, 8, 32
    decay_rate = 0.9

    # Deterministic "model" parameters (two versions: init and after a "step").
    model_params_v0 = {
        "w": jax.random.normal(k1, (H, H), jnp.float32) * 0.1,
        "b": jax.random.normal(k2, (H,), jnp.float32) * 0.1,
    }
    model_params_v1 = {
        "w": model_params_v0["w"] + jax.random.normal(k3, (H, H), jnp.float32) * 0.01,
        "b": model_params_v0["b"] + jax.random.normal(k4, (H,), jnp.float32) * 0.01,
    }

    swa = AlphaFoldSWA(model_params_v0, enabled=True, decay_rate=decay_rate)
    swa.update(model_params_v0)   # first update -> copy
    swa.update(model_params_v1)   # second update -> EMA via Pallas kernel

    x = jax.random.normal(k5, (B, S, H), jnp.float32)
    y = swa.forward(x)
    y = jax.block_until_ready(y)

    # Reference check.
    ref_w = _ref_ema(model_params_v0["w"], model_params_v1["w"], decay_rate)
    ref_b = _ref_ema(model_params_v0["b"], model_params_v1["b"], decay_rate)
    y_ref = _ref_forward(x, ref_w, ref_b)

    avg = swa.averaged_params
    assert y.shape == (B, S, H)
    assert jnp.allclose(y, y_ref, atol=1e-4, rtol=1e-4), "mismatch vs reference"
    assert jnp.allclose(avg["w"], ref_w, atol=1e-6)
    assert jnp.allclose(avg["b"], ref_b, atol=1e-6)

    print("KERNEL_OK")
</pallas_src>

<mosaic_0001>
module attributes {stable_mosaic.version = 11 : i64} {
  func.func @_ema_kernel(%arg0: i32, %arg1: memref<8x512xf32, #tpu.memory_space<vmem>>, %arg2: memref<8x512xf32, #tpu.memory_space<vmem>>, %arg3: memref<1xf32, #tpu.memory_space<smem>>, %arg4: memref<8x512xf32, #tpu.memory_space<vmem>>) attributes {dimension_semantics = [#tpu.dimension_semantics<parallel>], iteration_bounds = array<i64: 1>, scalar_prefetch = 0 : i64, scratch_operands = 0 : i64, tpu.core_type = #tpu.core_type<tc>, window_params = [{transform_indices = @transform_0, window_bounds = array<i64: 8, 512>}, {transform_indices = @transform_1, window_bounds = array<i64: 8, 512>}, {transform_indices = @transform_2, window_bounds = array<i64: 1>}, {transform_indices = @transform_3, window_bounds = array<i64: 8, 512>}]} {
    %c0 = arith.constant 0 : index
    %0 = memref.load %arg3[%c0] : memref<1xf32, #tpu.memory_space<smem>>
    %c0_0 = arith.constant 0 : index
    %c0_1 = arith.constant 0 : index
    %1 = vector.load %arg1[%c0_0, %c0_1] : memref<8x512xf32, #tpu.memory_space<vmem>>, vector<8x512xf32>
    %c0_2 = arith.constant 0 : index
    %c0_3 = arith.constant 0 : index
    %2 = vector.load %arg2[%c0_2, %c0_3] : memref<8x512xf32, #tpu.memory_space<vmem>>, vector<8x512xf32>
    %3 = arith.subf %2, %1 : vector<8x512xf32>
    %cst = arith.constant 1.000000e+00 : f32
    %4 = arith.subf %cst, %0 : f32
    %5 = vector.broadcast %4 : f32 to vector<8x512xf32>
    %6 = arith.mulf %3, %5 : vector<8x512xf32>
    %7 = arith.addf %1, %6 : vector<8x512xf32>
    %c0_4 = arith.constant 0 : index
    %c0_5 = arith.constant 0 : index
    %8 = vector.load %arg4[%c0_4, %c0_5] : memref<8x512xf32, #tpu.memory_space<vmem>>, vector<8x512xf32>
    tpu.vector_store %arg4[%c0_4, %c0_5], %7 {strides = array<i32>} : memref<8x512xf32, #tpu.memory_space<vmem>>, vector<8x512xf32>,
    return
  }
  func.func @transform_0(%arg0: i32) -> (i32, i32) {
    %c0_i32 = arith.constant 0 : i32
    %c0_i32_0 = arith.constant 0 : i32
    return %arg0, %c0_i32 : i32, i32
  }
  func.func @transform_1(%arg0: i32) -> (i32, i32) {
    %c0_i32 = arith.constant 0 : i32
    %c0_i32_0 = arith.constant 0 : i32
    return %arg0, %c0_i32 : i32, i32
  }
  func.func @transform_2(%arg0: i32) -> i32 {
    %c0_i32 = arith.constant 0 : i32
    %c0_i32_0 = arith.constant 0 : i32
    return %c0_i32 : i32
  }
  func.func @transform_3(%arg0: i32) -> (i32, i32) {
    %c0_i32 = arith.constant 0 : i32
    %c0_i32_0 = arith.constant 0 : i32
    return %arg0, %c0_i32 : i32, i32
  }
}

</mosaic_0001>

<bundles_post_ra>
// kernel: _ema_update_slab.1
= control target key start
LH: loop header
LB: loop body
LE: loop exit
PB: predicated region body
PF: predicated region fallthrough
CT: control target
= control target key end

     0   :  { %9 = vsyncpa [#allocation4], 0  ;;  %s220_s0 = inlined_call_operand.hbm [shape: f32[8,512], index: 0, kind: input, shape index: {}, may-alias: {0,3}]   ;;  %s221_s1 = inlined_call_operand.hbm [shape: f32[8,512], index: 1, kind: input, shape index: {}]   ;;  %s222_s2 = inlined_call_operand.<no memory space> [shape: f32[1], index: 2, kind: input, shape index: {}]   ;;  %s223_s3 = inlined_call_operand.hbm [shape: f32[8,512], index: 3, kind: output, shape index: {}, may-alias: {0,3}]  }
   0x1   :  { %10 = vsyncpa [#allocation7], 0 }
   0x2   :  { %11 = vsyncpa [#allocation5], 0  ;;  %s158_s12 = smov [#allocation3]   ;;  %s159_s14 = smov [#allocation6]  }
   0x3   :  { %s18_s13 = sshll.u32 %s158_s12, 4  ;;  %s28_s15 = sshll.u32 %s159_s14, 4  ;;  %s19_s13 = int_to_ptr.vmem [resolvable:$true] %s18_s13  ;;  %s29_s15 = int_to_ptr.vmem [resolvable:$true] %s28_s15 }
   0x4   :  { %s86_s18 = scalar_lea.hbm %s220_s0, 512 }
   0x5   :  { %p87_p0 = scmp.ne.s32.totalorder %s220_s0, %s86_s18  ;;  %p90_p1 = scmp.lt.u32.totalorder %s86_s18, %s220_s0 }
   0x7   :  { %p92_p2 = pnand %p90_p1, %p87_p0 }
   0x9   :  { %95 = shalt.err (!%p92_p2)
}
   0xa   :  { %s96_s23 = scalar_lea.vmem %s19_s13, 512  ;;  %p101_p4 = scmp.lt.s32.totalorder %s19_s13, %s19_s13 }
   0xb   :  { %p97_p3 = scmp.ne.s32.totalorder %s19_s13, %s96_s23  ;;  %p102_p5 = scmp.lt.s32.totalorder %s96_s23, %s96_s23 }
   0xd   :  { %p103_p6 = por %p102_p5, %p101_p4 }
   0xf   :  { %p104_p7 = pnand %p103_p6, %p97_p3 }
  0x11   :  { %107 = shalt.err (!%p104_p7)
}
  0x12   :  { %21 = dma.hbm_to_vmem [thread:$0]  %s220_s0, 512, %s19_s13, [#allocation4]  }
  0x13   :  { %s108_s28 = scalar_lea.hbm %s221_s1, 512 }
  0x14   :  { %p109_p8 = scmp.ne.s32.totalorder %s221_s1, %s108_s28  ;;  %p112_p9 = scmp.lt.u32.totalorder %s108_s28, %s221_s1 }
  0x16   :  { %p114_p10 = pnand %p112_p9, %p109_p8 }
  0x18   :  { %117 = shalt.err (!%p114_p10)
}
  0x19   :  { %s118_s6 = scalar_lea.vmem %s29_s15, 512  ;;  %p123_p12 = scmp.lt.s32.totalorder %s29_s15, %s29_s15 }
  0x1a   :  { %p119_p11 = scmp.ne.s32.totalorder %s29_s15, %s118_s6  ;;  %p124_p13 = scmp.lt.s32.totalorder %s118_s6, %s118_s6 }
  0x1c   :  { %p125_p0 = por %p124_p13, %p123_p12 }
  0x1e   :  { %p126_p1 = pnand %p125_p0, %p119_p11 }
  0x20   :  { %129 = shalt.err (!%p126_p1)
}
  0x21   :  { %31 = dma.hbm_to_vmem [thread:$0]  %s221_s1, 512, %s29_s15, [#allocation7]  }
  0x22   :  { %152 = dma.done.wait [#allocation4], 512  }
  0x23   :  { %153 = vsyncadd [#allocation4], 4294966784 }
  0x24   :  { %154 = dma.done.wait [#allocation7], 512  }
  0x25   :  { %155 = vsyncadd [#allocation7], 4294966784  ;;  %s53_s10 = ssub.f32 1.0, %s222_s2  ;;  %v41_v0 = vld [vmem:[#allocation3] sm:$0xff]  ;;  %v42_v3 = vld [vmem:[#allocation3 + $0x8] sm:$0xff]  ;;  %s160_s1 = smov [#allocation8]  }
  0x26   :  { %v45_v1 = vld [vmem:[#allocation6] sm:$0xff]  ;;  %v46_v5 = vld [vmem:[#allocation6 + $0x8] sm:$0xff]  ;;  %v43_v6 = vld [vmem:[#allocation3 + $0x10] sm:$0xff]  ;;  %s73_s11 = sshll.u32 %s160_s1, 4  ;;  %s74_s11 = int_to_ptr.vmem [resolvable:$true] %s73_s11 }
  0x27   :  { %v54_v2 = vstv %s53_s10  ;;  %v49_v4 = vsub.f32 %v45_v1, %v41_v0  ;;  %v47_v7 = vld [vmem:[#allocation6 + $0x10] sm:$0xff]  ;;  %v50_v8 = vsub.f32 %v46_v5, %v42_v3  ;;  %v44_v10 = vld [vmem:[#allocation3 + $0x18] sm:$0xff]  ;;  %s130_s2 = scalar_lea.vmem %s74_s11, 512  ;;  %p135_p3 = scmp.lt.s32.totalorder %s74_s11, %s74_s11 }
  0x28   :  { %v51_v9 = vsub.f32 %v47_v7, %v43_v6  ;;  %v48_v11 = vld [vmem:[#allocation6 + $0x18] sm:$0xff]  ;;  %p131_p2 = scmp.ne.s32.totalorder %s74_s11, %s130_s2  ;;  %p136_p4 = scmp.lt.s32.totalorder %s130_s2, %s130_s2 }
  0x29   :  { %v55_v12 = vmul.f32 %v54_v2, %v49_v4  ;;  %v52_v13 = vsub.f32 %v48_v11, %v44_v10  ;;  %v56_v14 = vmul.f32 %v54_v2, %v50_v8 }
  0x2a   :  { %v57_v15 = vmul.f32 %v54_v2, %v51_v9  ;;  %p137_p5 = por %p136_p4, %p135_p3 }
  0x2b   :  { %v59_v16 = vadd.f32 %v55_v12, %v41_v0  ;;  %v58_v17 = vmul.f32 %v54_v2, %v52_v13  ;;  %v60_v18 = vadd.f32 %v56_v14, %v42_v3 }
  0x2c   :  { %v61_v19 = vadd.f32 %v57_v15, %v43_v6  ;;  %p138_p6 = pnand %p137_p5, %p131_p2 }
  0x2d   :  { %63 = vst [vmem:[#allocation8] sm:$0xff] %v59_v16  ;;  %v62_v20 = vadd.f32 %v58_v17, %v44_v10  ;;  %64 = vst [vmem:[#allocation8 + $0x8] sm:$0xff] %v60_v18 }
  0x2e   :  { %65 = vst [vmem:[#allocation8 + $0x10] sm:$0xff] %v61_v19 }
  0x2f   :  { %66 = vst [vmem:[#allocation8 + $0x18] sm:$0xff] %v62_v20 }
  0x30   :  { %141 = shalt.err (!%p138_p6)
}
  0x31   :  { %s142_s14 = scalar_lea.hbm %s223_s3, 512 }
  0x32   :  { %p143_p7 = scmp.ne.s32.totalorder %s223_s3, %s142_s14  ;;  %p146_p8 = scmp.lt.u32.totalorder %s142_s14, %s223_s3 }
  0x34   :  { %p148_p9 = pnand %p146_p8, %p143_p7 }
  0x36   :  { %151 = shalt.err (!%p148_p9)
}
  0x37   :  { %76 = dma.vmem_to_hbm [thread:$0]  %s74_s11, 512, %s223_s3, [#allocation5]  }
  0x38   :  { %156 = dma.done.wait [#allocation5], 512  }
  0x39   :  { %157 = vsyncadd [#allocation5], 4294966784 }
  0x3a   :  { %80 = vsyncpa [#allocation4], 1 }
  0x3b   :  { %81 = vsyncpa [#allocation7], 1 }
  0x3c   :  { %82 = vsyncpa [#allocation5], 1 }

</bundles_post_ra>
